<compile_context>
chip_gen: v7x
topology: tpu7x:2x2x1
jax: 0.10.0
libtpu: 0.0.40
codegen_flags: <defaults>
</compile_context>

<pallas_src>
import functools

import jax
import jax.numpy as jnp
from jax import lax
from jax.experimental import pallas as pl
from jax.experimental.pallas import tpu as pltpu


def _round_up(a, b):
    return (a + b - 1) // b * b


# ----------------------------- Pallas kernel --------------------------------
def _mono_multi_kernel(x_ref, w_ref, o_ref, *, precision):
    """One batch tile: y = x_tile @ t(w).

    x_ref: (TB, P)  streamed input tile (f32 or bf16)
    w_ref: (P, 1)   pre-transformed monotone weights, same dtype as x
    o_ref: (TB, 1)  f32 output tile
    """
    o_ref[...] = jnp.dot(
        x_ref[...],
        w_ref[...],
        preferred_element_type=jnp.float32,
        precision=precision,
    ).astype(o_ref.dtype)


# ------------------- weight transform (once per call, JAX) ------------------
def mono_trafo_multi(w, dim_bsp):
    """JAX mirror of the torch transform: row 0 raw, softplus rows 1.., cumsum axis=1."""
    P = w.shape[0]
    w_res = w.reshape(dim_bsp, P // dim_bsp).astype(jnp.float32)
    pre = jnp.concatenate([w_res[:1, :], jax.nn.softplus(w_res[1:, :])], axis=0)
    return jnp.cumsum(pre, axis=1).reshape(P, 1)


# ------------------------------- wrapper -------------------------------------
def _choose_tile_rows(B, P, itemsize, target_tile_bytes):
    """Tile rows so one x tile is ~target_tile_bytes and >=2 grid tiles exist when B allows."""
    mult = 16 if itemsize < 4 else 8            # bf16 sublane packing needs 16
    tb = max(target_tile_bytes // max(P * itemsize, 1), mult)
    tb = min(tb, -(-B // 2))                    # >=2 tiles when possible (v7x megacore)
    tb = min(tb, B)
    tb = _round_up(max(tb, 1), mult)
    return tb, mult


def mono_multi_layer_forward(x, kernel, dim_bsp, *, target_tile_bytes=4 << 20):
    """x: (B, P), kernel: (P, 1)  ->  (B, 1) float32.

    Pass x as bf16 to halve HBM traffic; accumulation is f32 on the MXU.
    """
    B, P = x.shape
    assert kernel.shape == (P, 1), "mono_trafo_multi requires output_dim == 1"
    assert P % dim_bsp == 0

    # Once-per-call O(P) weight transform, cast to x's dtype so the in-kernel dot
    # is a native single-pass MXU matvec for bf16.
    t_w = mono_trafo_multi(kernel, dim_bsp).astype(x.dtype)          # (P, 1)

    itemsize = jnp.dtype(x.dtype).itemsize
    TB, _ = _choose_tile_rows(B, P, itemsize, target_tile_bytes)

    # Only pad when B is smaller than one tile-row multiple (a few rows, negligible).
    # Otherwise the ragged last block is handled by Pallas: rows are independent,
    # overhang outputs are masked/discarded by the final slice.
    Bp = B
    if B < TB:
        Bp = TB
        x = jnp.pad(x, ((0, Bp - B), (0, 0)))
    num_tiles = pl.cdiv(Bp, TB)

    # VMEM sizing: double-buffered x tiles + weights + output, 2x headroom,
    # capped well under v7x's 64 MiB per-TC physical VMEM.
    tile_bytes = TB * P * itemsize
    vmem_need = 2 * tile_bytes + 2 * TB * 4 + 2 * P * itemsize + (1 << 16)
    vmem_limit = int(min(max(2 * vmem_need, 8 << 20), 48 << 20))

    # HIGHEST precision only for f32 inputs (full f32 accuracy vs the reference);
    # bf16 inputs use the native single-pass bf16 MXU path.
    precision = lax.Precision.HIGHEST if x.dtype == jnp.float32 else None
    kern = functools.partial(_mono_multi_kernel, precision=precision)

    y = pl.pallas_call(
        kern,
        out_shape=jax.ShapeDtypeStruct((Bp, 1), jnp.float32),
        grid=(num_tiles,),
        in_specs=[
            pl.BlockSpec((TB, P), lambda i: (i, 0)),     # streamed batch tile
            pl.BlockSpec((P, 1), lambda i: (0, 0)),      # replicated transformed weights
        ],
        out_specs=pl.BlockSpec((TB, 1), lambda i: (i, 0)),
        compiler_params=pltpu.CompilerParams(
            dimension_semantics=("parallel",),           # megacore-shardable batch axis
            vmem_limit_bytes=vmem_limit,
        ),
        cost_estimate=pl.CostEstimate(
            flops=2 * Bp * P,
            transcendentals=0,
            bytes_accessed=Bp * P * itemsize + Bp * 4 + P * itemsize,
        ),
    )(x, t_w)
    return y[:B]


# ---------------- pure-JAX reference (mirrors the torch code) ----------------
def mono_multi_layer_ref(x, kernel, dim_bsp):
    return x.astype(jnp.float32) @ mono_trafo_multi(kernel, dim_bsp)


if __name__ == "__main__":
    # Small shapes consistent with the module: batch=64, in_features=32,
    # dim_bsp=4 (so M = 8), output_dim=1.
    B, dim_bsp, M = 64, 4, 8
    P = dim_bsp * M

    key = jax.random.PRNGKey(0)
    kx, kw = jax.random.split(key)
    x = jax.random.normal(kx, (B, P), dtype=jnp.float32)
    # nn.init.normal_ default: N(0, 1); deterministic in-script init.
    kernel = jax.random.normal(kw, (P, 1), dtype=jnp.float32)

    # ---- f32 path: tight check against the reference ----
    y = jax.block_until_ready(mono_multi_layer_forward(x, kernel, dim_bsp))
    y_ref = mono_multi_layer_ref(x, kernel, dim_bsp)
    assert y.shape == (B, 1)
    assert jnp.allclose(y, y_ref, atol=1e-4, rtol=1e-4), (y, y_ref)

    # ---- bf16 fast path (recommended: halves HBM traffic), checked against a
    #      matching bf16 reference (same bf16 inputs/weights, f32 accumulation) ----
    x_bf = x.astype(jnp.bfloat16)
    y_bf = jax.block_until_ready(mono_multi_layer_forward(x_bf, kernel, dim_bsp))
    t_w_bf = mono_trafo_multi(kernel, dim_bsp).astype(jnp.bfloat16)
    y_bf_ref = x_bf.astype(jnp.float32) @ t_w_bf.astype(jnp.float32)
    assert y_bf.shape == (B, 1)
    assert jnp.allclose(y_bf, y_bf_ref, atol=1e-3, rtol=1e-3), (y_bf, y_bf_ref)

    print("KERNEL_OK")
</pallas_src>

<mosaic_0001>
module attributes {stable_mosaic.version = 11 : i64} {
  func.func @_mono_multi_kernel(%arg0: i32, %arg1: memref<32x32xf32, #tpu.memory_space<vmem>>, %arg2: memref<32x1xf32, #tpu.memory_space<vmem>>, %arg3: memref<32x1xf32, #tpu.memory_space<vmem>>) attributes {dimension_semantics = [#tpu.dimension_semantics<parallel>], iteration_bounds = array<i64: 2>, scalar_prefetch = 0 : i64, scratch_operands = 0 : i64, tpu.core_type = #tpu.core_type<tc>, window_params = [{transform_indices = @transform_0, window_bounds = array<i64: 32, 32>}, {pipeline_mode = #tpu.pipeline_mode<synchronous>, transform_indices = @transform_1, window_bounds = array<i64: 32, 1>}, {transform_indices = @transform_2, window_bounds = array<i64: 32, 1>}]} {
    %c0 = arith.constant 0 : index
    %c0_0 = arith.constant 0 : index
    %0 = vector.load %arg1[%c0, %c0_0] : memref<32x32xf32, #tpu.memory_space<vmem>>, vector<32x32xf32>
    %c0_1 = arith.constant 0 : index
    %c0_2 = arith.constant 0 : index
    %1 = vector.load %arg2[%c0_1, %c0_2] : memref<32x1xf32, #tpu.memory_space<vmem>>, vector<32x1xf32>
    %cst = arith.constant dense<0.000000e+00> : vector<32x1xf32>
    %2 = tpu.matmul %0, %1, %cst {dimension_numbers = #tpu.dot_dimension_numbers<[1], [0], [0], [1], [0, 0, 1, 1], [], []>, precision = #tpu.contract_precision<fp32>} : vector<32x32xf32>, vector<32x1xf32>, vector<32x1xf32> -> vector<32x1xf32>
    %c0_3 = arith.constant 0 : index
    %c0_4 = arith.constant 0 : index
    %3 = vector.load %arg3[%c0_3, %c0_4] : memref<32x1xf32, #tpu.memory_space<vmem>>, vector<32x1xf32>
    tpu.vector_store %arg3[%c0_3, %c0_4], %2 {strides = array<i32>} : memref<32x1xf32, #tpu.memory_space<vmem>>, vector<32x1xf32>,
    return
  }
  func.func @transform_0(%arg0: i32) -> (i32, i32) {
    %c0_i32 = arith.constant 0 : i32
    %c0_i32_0 = arith.constant 0 : i32
    return %arg0, %c0_i32 : i32, i32
  }
  func.func @transform_1(%arg0: i32) -> (i32, i32) {
    %c0_i32 = arith.constant 0 : i32
    %c0_i32_0 = arith.constant 0 : i32
    %c0_i32_1 = arith.constant 0 : i32
    return %c0_i32, %c0_i32_0 : i32, i32
  }
  func.func @transform_2(%arg0: i32) -> (i32, i32) {
    %c0_i32 = arith.constant 0 : i32
    %c0_i32_0 = arith.constant 0 : i32
    return %arg0, %c0_i32 : i32, i32
  }
}

</mosaic_0001>

<bundles_post_ra>
// kernel: tpu_custom_call.1
= control target key start
LH: loop header
LB: loop body
LE: loop exit
PB: predicated region body
PF: predicated region fallthrough
CT: control target
= control target key end

     0   :  { %s1085_s9 = smov 0   ;;  %s1173_s0 = inlined_call_operand.vmem [shape: f32[64,32], index: 0, kind: input, shape index: {}]   ;;  %s1174_s1 = inlined_call_operand.vmem [shape: f32[32,1], index: 1, kind: input, shape index: {}]   ;;  %s1175_s2 = inlined_call_operand.vmem [shape: f32[64,1], index: 2, kind: output, shape index: {}]  }
   0x1 LB: > { %s843_s10 = sadd.s32 4294967295, %s1068_s9   ;;  %p847_p0 = scmp.ge.s32.totalorder %s1068_s9, 1  ;;  %s1068_s9 = sphi %s1085_s9, %s12_s9  }
   0x2   : > { %p113_p1 = scmp.lt.s32.totalorder %s1068_s9, 3 }
   0x4   : > { %p114_p2 = pnand %p847_p0, %p113_p1 }
   0x5   : > { %v151_v0 = vld [vmem:[%s1174_s1] sm:$0xff] (!%p114_p2)  ;;  %v152_v1 = vld [vmem:[%s1174_s1 + $0x8] sm:$0xff] (!%p114_p2)  ;;  %v153_v2 = vld [vmem:[%s1174_s1 + $0x10] sm:$0xff] (!%p114_p2)  ;;  %s848_s17 = sshll.u32 (!%p114_p2), %s843_s10, 2  ;;  %vm155_vm0 = vcmask (!%p114_p2), 261120   ;;  %vm782_vm1 = vcmask (!%p114_p2), 7168  }
   0x6   : > { %117 = sbr.rel (%p114_p2) target bundleno = 265 (0x109), region = 28  ;;  %v169_v3 = vand.u32 (!%p114_p2), 4294901760, %v151_v0  ;;  %v172_v4 = vand.u32 (!%p114_p2), 4294901760, %v152_v1  ;;  %v154_v5 = vld [vmem:[%s1174_s1 + $0x18] sm:$0xff] (!%p114_p2)  ;;  %v175_v6 = vand.u32 (!%p114_p2), 4294901760, %v153_v2  ;;  %p136_p3 = scmp.lt.s32.totalorder (!%p114_p2), %s848_s17, 7 }
   0x7   : > { %v178_v7 = vand.u32 (!%p114_p2), 4294901760, %v154_v5 }
   0x8   : > { %v1105_v8 = vpack.c.bf16 (!%p114_p2), %v172_v4, %v169_v3  ;;  %v1109_v9 = vsub.f32 (!%p114_p2), %v151_v0, %v169_v3  ;;  %v1111_v10 = vsub.f32 (!%p114_p2), %v152_v1, %v172_v4  ;;  %v1113_v11 = vsub.f32 (!%p114_p2), %v153_v2, %v175_v6 }
   0x9   : > { %v1115_v12 = vpack.c.bf16 (!%p114_p2), %v178_v7, %v175_v6  ;;  %v1117_v13 = vsub.f32 (!%p114_p2), %v154_v5, %v178_v7 }
   0xa   : > { %1011 = vmatprep.subr.bf16.mxu0 (!%p114_p2), %v1105_v8  ;;  %987 = vmatprep.subr.bf16.mxu1 (!%p114_p2), %v1105_v8  ;;  %v280_v14 = vand.u32 (!%p114_p2), 4294901760, %v1109_v9  ;;  %v287_v15 = vand.u32 (!%p114_p2), 4294901760, %v1111_v10  ;;  %v294_v16 = vand.u32 (!%p114_p2), 4294901760, %v1113_v11  ;;  %v1002_v58 = vpack.c.bf16 (!%p114_p2), %v1111_v10, %v1109_v9 }
   0xb   : > { %1013 = vmatpush3.bf16.msra.mxu0 (!%p114_p2), %v1105_v8  ;;  %989 = vmatpush3.bf16.msra.mxu1 (!%p114_p2), %v1105_v8  ;;  %v301_v17 = vand.u32 (!%p114_p2), 4294901760, %v1117_v13  ;;  %v1006_v59 = vpack.c.bf16 (!%p114_p2), %v1117_v13, %v1113_v11 }
   0xc   : > { %1015 = vmatprep.subr.bf16.mxu0 (!%p114_p2), %v1115_v12  ;;  %991 = vmatprep.subr.bf16.mxu1 (!%p114_p2), %v1115_v12  ;;  %v1018_v20 = vpack.c.bf16 (!%p114_p2), %v287_v15, %v280_v14  ;;  %v281_v21 = vsub.f32 (!%p114_p2), %v1109_v9, %v280_v14  ;;  %v288_v22 = vsub.f32 (!%p114_p2), %v1111_v10, %v287_v15 }
   0xd   : > { %s1177_s17 = smov (!%p136_p3, %s848_s17), 7  ;;  %v295_v34 = vsub.f32 %v1113_v11, %v294_v16  ;;  %v302_v35 = vsub.f32 %v1117_v13, %v301_v17  ;;  %v1022_v45 = vpack.c.bf16 %v301_v17, %v294_v16 }
   0xe   : > { %s849_s20 = sshll.u32 %s1177_s17, 3  ;;  %v282_v30 = vand.u32 4294901760, %v281_v21  ;;  %v289_v31 = vand.u32 4294901760, %v288_v22 }
   0xf   : > { %s139_s23 = scalar_lea.vmem %s1173_s0, %s849_s20  ;;  %1017 = vmatpush3.bf16.msra.mxu0 %v1115_v12  ;;  %993 = vmatpush3.bf16.msra.mxu1 %v1115_v12  ;;  %v296_v46 = vand.u32 4294901760, %v295_v34  ;;  %v303_v47 = vand.u32 4294901760, %v302_v35  ;;  %s145_s26 = scalar_lea.vmem %s1175_s2, %s849_s20 }
  0x10   : > { %v147_v18 = vld [vmem:[%s139_s23] sm:$0xff]  ;;  %v148_v19 = vld [vmem:[%s139_s23 + $0x8] sm:$0xff]  ;;  %v149_v23 = vld [vmem:[%s139_s23 + $0x10] sm:$0xff]  ;;  %1019 = vmatprep.subr.bf16.mxu0 %v1018_v20  ;;  %v994_v38 = vpack.c.bf16 %v289_v31, %v282_v30 }
  0x11   : > { %v157_v24 = vsel %vm155_vm0, %v147_v18, 0  ;;  %v160_v25 = vsel %vm155_vm0, %v148_v19, 0  ;;  %v163_v26 = vsel %vm155_vm0, %v149_v23, 0  ;;  %v150_v27 = vld [vmem:[%s139_s23 + $0x18] sm:$0xff]  ;;  %v998_v56 = vpack.c.bf16 %v303_v47, %v296_v46 }
  0x12   : > { %v1140_v28 = vand.u32 4294901760, %v157_v24  ;;  %v1142_v29 = vand.u32 4294901760, %v160_v25  ;;  %v257_v32 = vand.u32 4294901760, %v163_v26  ;;  %v166_v33 = vsel %vm155_vm0, %v150_v27, 0  ;;  %995 = vmatprep.subr.bf16.mxu1 %v994_v38 }
  0x13   : > { %v267_v39 = vand.u32 4294901760, %v166_v33 }
  0x14   : > { %v238_v36 = vsub.f32 %v157_v24, %v1140_v28  ;;  %v248_v37 = vsub.f32 %v160_v25, %v1142_v29  ;;  %v258_v40 = vsub.f32 %v163_v26, %v257_v32 }
  0x15   : > { %v268_v43 = vsub.f32 %v166_v33, %v267_v39 }
  0x16   : > { %v239_v41 = vand.u32 4294901760, %v238_v36  ;;  %v249_v42 = vand.u32 4294901760, %v248_v37  ;;  %v259_v44 = vand.u32 4294901760, %v258_v40 }
  0x17   : > { %v269_v50 = vand.u32 4294901760, %v268_v43 }
  0x18   : > { %952 = vmatprep.mubr.f32.mxu0 %v239_v41  ;;  %v240_v48 = vsub.f32 %v238_v36, %v239_v41  ;;  %v250_v49 = vsub.f32 %v248_v37, %v249_v42  ;;  %v260_v51 = vsub.f32 %v258_v40, %v259_v44 }
  0x19   : > { %953 = vmatmul.mubr.f32.vlgmr.msra.gmra.mrb[0].mxu0 %v249_v42  ;;  %v270_v54 = vsub.f32 %v268_v43, %v269_v50 }
  0x1a   : > { %1021 = vmatpush3.bf16.msra.mxu0 %v1018_v20  ;;  %v241_v52 = vand.u32 4294901760, %v240_v48  ;;  %955 = vmatprep.mubr.f32.mxu0 %v259_v44  ;;  %v251_v53 = vand.u32 4294901760, %v250_v49  ;;  %v261_v55 = vand.u32 4294901760, %v260_v51 }
  0x1b   : > { %1023 = vmatprep.subr.bf16.mxu0 %v1022_v45  ;;  %v271_v57 = vand.u32 4294901760, %v270_v54 }
  0x1c   : > { %910 = vmatprep.mubr.f32.mxu1 %v241_v52 }
  0x1d   : > { %911 = vmatmul.mubr.f32.vlgmr.msra.gmra.mrb[0].mxu1 %v251_v53  ;;  %956 = vmatmul.mubr.f32.gmra.mrb[2].mxu0 %v269_v50 }
  0x1e   : > { %997 = vmatpush3.bf16.msra.mxu1 %v994_v38  ;;  %1025 = vmatpush3.bf16.msra.mxu0 %v1022_v45 }
  0x1f   : > { %913 = vmatprep.mubr.f32.mxu1 %v261_v55  ;;  %999 = vmatprep.subr.bf16.mxu1 %v998_v56 }
  0x20   : > { %966 = vmatprep.mubr.f32.mxu0 %v1140_v28  ;;  %1027 = vmatprep.subr.bf16.mxu0 %v1105_v8 }
  0x21   : > { %914 = vmatmul.mubr.f32.gmra.mrb[2].mxu1 %v271_v57  ;;  %967 = vmatmul.mubr.f32.vlgmr.msra.gmra.mrb[0].mxu0 %v1142_v29 }
  0x22   : > { %1001 = vmatpush3.bf16.msra.mxu1 %v998_v56  ;;  %1029 = vmatpush3.bf16.msra.mxu0 %v1105_v8 }
  0x23   : > { %924 = vmatprep.mubr.f32.mxu1 %v1140_v28  ;;  %1003 = vmatprep.subr.bf16.mxu1 %v1002_v58 }
  0x24   : > { %969 = vmatprep.mubr.f32.mxu0 %v257_v32  ;;  %1031 = vmatprep.subr.bf16.mxu0 %v1115_v12 }
  0x25   : > { %925 = vmatmul.mubr.f32.vlgmr.msra.gmra.mrb[0].mxu1 %v1142_v29  ;;  %970 = vmatmul.mubr.f32.gmra.mrb[2].mxu0 %v267_v39 }
  0x26   : > { %1005 = vmatpush3.bf16.msra.mxu1 %v1002_v58  ;;  %1033 = vmatpush3.bf16.msra.mxu0 %v1115_v12 }
  0x27   : > { %927 = vmatprep.mubr.f32.mxu1 %v257_v32  ;;  %1007 = vmatprep.subr.bf16.mxu1 %v1006_v59 }
  0x28   : > { %980 = vmatprep.mubr.f32.mxu0 %v1140_v28 }
  0x29   : > { %928 = vmatmul.mubr.f32.gmra.mrb[2].mxu1 %v267_v39  ;;  %981 = vmatmul.mubr.f32.vlgmr.msra.gmra.mrb[0].mxu0 %v1142_v29 }
  0x2a   : > { %1009 = vmatpush3.bf16.msra.mxu1 %v1006_v59  ;;  %938 = vmatprep.mubr.f32.mxu1 %v238_v36 }
  0x2b   : > { %983 = vmatprep.mubr.f32.mxu0 %v257_v32 }
  0x2d   : > { %939 = vmatmul.mubr.f32.vlgmr.msra.gmra.mrb[0].mxu1 %v248_v37  ;;  %984 = vmatmul.mubr.f32.gmra.mrb[2].mxu0 %v267_v39 }
  0x2e   : > { %941 = vmatprep.mubr.f32.mxu1 %v258_v40 }
  0x31   : > { %942 = vmatmul.mubr.f32.gmra.mrb[2].mxu1 %v268_v43 }
  0xfc   : > { %v982_v60 = vpop.f32.mrb[0].mxu0 }
  0xfd   : > { %v760_v61 = vpop.f32.mrb[1].mxu0 }
 0x100   : > { %v940_v62 = vpop.f32.mrb[0].mxu1  ;;  %v985_v63 = vpop.f32.mrb[2].mxu0 }
 0x101   : > { %v1034_v0 = vadd.f32 %v982_v60, %v940_v62  ;;  %v462_v1 = vpop.f32.mrb[1].mxu1  ;;  %v772_v2 = vpop.f32.mrb[3].mxu0 }
 0x102   : > { %v1035_v3 = vadd.f32 %v760_v61, %v462_v1 }
 0x103   : > { %784 = vst.msk [vmem:[%s145_s26 + $0x8] sm:$0xff] %vm782_vm1, %v1034_v0 }
 0x104   : > { %783 = vst.msk [vmem:[%s145_s26] sm:$0xff] %vm782_vm1, %v1035_v3  ;;  %v943_v4 = vpop.f32.mrb[2].mxu1 }
 0x105   : > { %v1036_v5 = vadd.f32 %v985_v63, %v943_v4  ;;  %v476_v6 = vpop.f32.mrb[3].mxu1 }
 0x106   : > { %v1037_v7 = vadd.f32 %v772_v2, %v476_v6 }
 0x107   : > { %786 = vst.msk [vmem:[%s145_s26 + $0x18] sm:$0xff] %vm782_vm1, %v1036_v5 }
 0x108   : > { %785 = vst.msk [vmem:[%s145_s26 + $0x10] sm:$0xff] %vm782_vm1, %v1037_v7 }
 0x109 PF: > { %s12_s9 = sadd.s32 1, %s1068_s9  }
 0x10a   : > { %p9_p4 = scmp.ge.s32.totalorder %s12_s9, 4  }
 0x10c   :  { %11 = sbr.rel (!%p9_p4) target bundleno = 1 (0x1), region = 58 }

</bundles_post_ra>
